<compile_context>
chip_gen: v7x
topology: tpu7x:2x2x1
jax: 0.10.0
libtpu: 0.0.40
codegen_flags: <defaults>
</compile_context>

<pallas_src>
import jax
import jax.numpy as jnp
from jax.experimental import pallas as pl
from jax.experimental.pallas import tpu as pltpu


def _log_softmax_kernel(x_ref, o_ref):
    # x_ref / o_ref: (TILE_N, F) tile in VMEM; log-softmax over the last axis.
    x = x_ref[...].astype(jnp.float32)
    m = jnp.max(x, axis=1, keepdims=True)
    sum_exp = jnp.sum(jnp.exp(x - m), axis=1, keepdims=True)
    # Fused store: the shifted values are never kept as a separate live temp.
    o_ref[...] = (x - (m + jnp.log(sum_exp))).astype(o_ref.dtype)


def _round_up(x, m):
    return ((x + m - 1) // m) * m


def _round_down(x, m):
    return (x // m) * m


def _tensorcores_per_chip():
    """Best-effort TensorCore count per chip; never raises."""
    try:
        kind = jax.devices()[0].device_kind.lower()
    except Exception:
        return 1
    # Single-TensorCore generations: v5e ("v5 lite"/"v5e") and v6e.
    if "lite" in kind or "v5e" in kind or "v6" in kind:
        return 1
    # v7x (and other megacore parts) expose 2 TensorCores per chip.
    return 2


_TILE_BYTES_CAP = 2 * 1024 * 1024   # f32 bytes per tile (rows * F * 4)
_MAX_TILE_ROWS = 512                # bigger tiles buy nothing past ~85% roofline


def _choose_tile_n(n, f):
    bytes_per_row = f * 4  # f32 compute tiles
    tile = _round_down(_TILE_BYTES_CAP // bytes_per_row, 8)
    tile = max(min(tile, _MAX_TILE_ROWS), 8)
    if n <= tile:
        # One block covering all rows; a full-dim block is exempt from the
        # sublane-divisibility rule, so no row padding is ever required.
        return n
    # Multi-TensorCore chips: aim for >= 4 grid steps so the "parallel" axis
    # splits across both cores and each core still pipelines DMA vs compute.
    if _tensorcores_per_chip() >= 2:
        tile = min(tile, max(_round_up(pl.cdiv(n, 4), 8), 8))
    return tile


@jax.jit
def domain_classifier_forward(feature):
    """Pallas implementation of Domain_classfier.forward: log_softmax(dim=1)."""
    n, f = feature.shape
    tile_n = _choose_tile_n(n, f)
    grid = (pl.cdiv(n, tile_n),)

    # ~7 tile-equivalents of real usage (2x double-buffered input, 2x output,
    # in-kernel f32 temporaries) + headroom for compiler internal scratch.
    tile_bytes = tile_n * f * 4
    vmem_limit = int(min(max(8 * tile_bytes + (2 << 20), 8 << 20), 48 << 20))

    return pl.pallas_call(
        _log_softmax_kernel,
        out_shape=jax.ShapeDtypeStruct((n, f), feature.dtype),
        grid_spec=pl.GridSpec(
            grid=grid,
            in_specs=[pl.BlockSpec((tile_n, f), lambda i: (i, 0))],
            out_specs=pl.BlockSpec((tile_n, f), lambda i: (i, 0)),
        ),
        compiler_params=pltpu.CompilerParams(
            dimension_semantics=("parallel",),
            vmem_limit_bytes=vmem_limit,
        ),
    )(feature)


def _init_unused_class_classifier_params(key):
    """Parity with the PyTorch __init__: built but never used in forward."""
    k1, k2, k3 = jax.random.split(key, 3)
    return {
        "c_fc1_w": jax.random.normal(k1, (2048, 100), jnp.float32) * 0.02,
        "c_fc1_b": jnp.zeros((100,), jnp.float32),
        "c_bn1_gamma": jnp.ones((100,), jnp.float32),
        "c_bn1_beta": jnp.zeros((100,), jnp.float32),
        "c_fc2_w": jax.random.normal(k2, (100, 100), jnp.float32) * 0.02,
        "c_fc2_b": jnp.zeros((100,), jnp.float32),
        "c_bn2_gamma": jnp.ones((100,), jnp.float32),
        "c_bn2_beta": jnp.zeros((100,), jnp.float32),
        "c_fc3_w": jax.random.normal(k3, (100, 65), jnp.float32) * 0.02,
        "c_fc3_b": jnp.zeros((65,), jnp.float32),
    }


if __name__ == "__main__":
    key = jax.random.PRNGKey(0)
    k_feat, k_params = jax.random.split(key)

    # Shapes consistent with the module: (batch, input_feature=1600),
    # log-softmax over dim=1.  F=1600 is not a multiple of 128, exercising the
    # full-F (non-lane-aligned) block path with masked trailing-vreg stores.
    N, F = 16, 1600
    feature = jax.random.normal(k_feat, (N, F), jnp.float32)

    # Unused in forward; constructed only for parity with the PyTorch __init__.
    _ = _init_unused_class_classifier_params(k_params)

    out = domain_classifier_forward(feature)
    out = jax.block_until_ready(out)

    # Correctness check against the plain-JAX reference.
    ref = jax.nn.log_softmax(feature, axis=1)
    assert out.shape == (N, F)
    assert jnp.allclose(out, ref, atol=1e-5, rtol=1e-5), "mismatch vs reference"
    assert jnp.allclose(jnp.sum(jnp.exp(out), axis=1), 1.0, atol=1e-5)

    print("KERNEL_OK")
</pallas_src>

<mosaic_0001>
module attributes {stable_mosaic.version = 11 : i64} {
  func.func @_log_softmax_kernel(%arg0: i32, %arg1: memref<16x1600xf32, #tpu.memory_space<vmem>>, %arg2: memref<16x1600xf32, #tpu.memory_space<vmem>>) attributes {dimension_semantics = [#tpu.dimension_semantics<parallel>], iteration_bounds = array<i64: 1>, scalar_prefetch = 0 : i64, scratch_operands = 0 : i64, tpu.core_type = #tpu.core_type<tc>, window_params = [{transform_indices = @transform_0, window_bounds = array<i64: 16, 1600>}, {transform_indices = @transform_1, window_bounds = array<i64: 16, 1600>}]} {
    %c0 = arith.constant 0 : index
    %c0_0 = arith.constant 0 : index
    %0 = vector.load %arg1[%c0, %c0_0] : memref<16x1600xf32, #tpu.memory_space<vmem>>, vector<16x1600xf32>
    %cst = arith.constant dense<0xFF800000> : vector<16xf32>
    %1 = vector.multi_reduction <maximumf>, %0, %cst [1] : vector<16x1600xf32> to vector<16xf32>
    %2 = vector.shape_cast %1 : vector<16xf32> to vector<16x1xf32>
    %3 = vector.broadcast %2 : vector<16x1xf32> to vector<16x1600xf32>
    %4 = arith.subf %0, %3 : vector<16x1600xf32>
    %5 = math.exp %4 : vector<16x1600xf32>
    %cst_1 = arith.constant dense<0.000000e+00> : vector<16xf32>
    %6 = vector.multi_reduction <add>, %5, %cst_1 [1] : vector<16x1600xf32> to vector<16xf32>
    %7 = vector.shape_cast %6 : vector<16xf32> to vector<16x1xf32>
    %8 = math.log %7 : vector<16x1xf32>
    %9 = arith.addf %2, %8 : vector<16x1xf32>
    %10 = vector.broadcast %9 : vector<16x1xf32> to vector<16x1600xf32>
    %11 = arith.subf %0, %10 : vector<16x1600xf32>
    %c0_2 = arith.constant 0 : index
    %c0_3 = arith.constant 0 : index
    %12 = vector.load %arg2[%c0_2, %c0_3] : memref<16x1600xf32, #tpu.memory_space<vmem>>, vector<16x1600xf32>
    tpu.vector_store %arg2[%c0_2, %c0_3], %11 {strides = array<i32>} : memref<16x1600xf32, #tpu.memory_space<vmem>>, vector<16x1600xf32>,
    return
  }
  func.func @transform_0(%arg0: i32) -> (i32, i32) {
    %c0_i32 = arith.constant 0 : i32
    %c0_i32_0 = arith.constant 0 : i32
    return %arg0, %c0_i32 : i32, i32
  }
  func.func @transform_1(%arg0: i32) -> (i32, i32) {
    %c0_i32 = arith.constant 0 : i32
    %c0_i32_0 = arith.constant 0 : i32
    return %arg0, %c0_i32 : i32, i32
  }
}

</mosaic_0001>

<bundles_post_ra>
// kernel: domain_classifier_forward.1
= control target key start
LH: loop header
LB: loop body
LE: loop exit
PB: predicated region body
PF: predicated region fallthrough
CT: control target
= control target key end

     0   :  { %6 = vsyncpa [#allocation3], 0  ;;  %s583_s0 = inlined_call_operand.hbm [shape: f32[16,1600], index: 0, kind: input, shape index: {}]   ;;  %s584_s1 = inlined_call_operand.hbm [shape: f32[16,1600], index: 1, kind: output, shape index: {}]  }
   0x1   :  { %7 = vsyncpa [#allocation4], 0  ;;  %s371_s6 = smov [#allocation2]   ;;  %s323_s10 = scalar_lea.hbm %s583_s0, 3328 }
   0x2   :  { %s13_s7 = sshll.u32 %s371_s6, 4  ;;  %p324_p0 = scmp.ne.s32.totalorder %s583_s0, %s323_s10  ;;  %s14_s7 = int_to_ptr.vmem [resolvable:$true] %s13_s7 }
   0x3   :  { %p327_p1 = scmp.lt.u32.totalorder %s323_s10, %s583_s0 }
   0x5   :  { %p329_p2 = pnand %p327_p1, %p324_p0 }
   0x7   :  { %332 = shalt.err (!%p329_p2)
}
   0x8   :  { %s333_s15 = scalar_lea.vmem %s14_s7, 3328  ;;  %p338_p4 = scmp.lt.s32.totalorder %s14_s7, %s14_s7 }
   0x9   :  { %p334_p3 = scmp.ne.s32.totalorder %s14_s7, %s333_s15  ;;  %p339_p5 = scmp.lt.s32.totalorder %s333_s15, %s333_s15 }
   0xb   :  { %p340_p6 = por %p339_p5, %p338_p4 }
   0xd   :  { %p341_p7 = pnand %p340_p6, %p334_p3 }
   0xf   :  { %344 = shalt.err (!%p341_p7)
}
  0x10   :  { %s372_s16 = smov 1664   ;;  %s373_s17 = smov 104  }
  0x11   :  { %19 = dma.hbm_to_vmem [thread:$0]  %s583_s0, 3328, %s14_s7, [#allocation3], %s372_s16, %s372_s16, %s373_s17  }
  0x12   :  { %367 = dma.done.wait [#allocation3], 3328  }
  0x13   :  { %368 = vsyncadd [#allocation3], 4294963968  ;;  %v400_v0 = vld [vmem:[#allocation2] sm:$0xff]  ;;  %v402_v1 = vld [vmem:[#allocation2 + $0x8] sm:$0xff]  ;;  %vm59_vm0 = vcmask 523264   ;;  %s374_s0 = smov [#allocation5]  }
  0x14   :  { %v404_v2 = vld [vmem:[#allocation2 + $0x10] sm:$0xff]  ;;  %v406_v3 = vld [vmem:[#allocation2 + $0x18] sm:$0xff]  ;;  %v408_v4 = vld [vmem:[#allocation2 + $0x20] sm:$0xff]  ;;  %s251_s20 = sshll.u32 %s374_s0, 4  ;;  %s252_s20 = int_to_ptr.vmem [resolvable:$true] %s251_s20 }
  0x15   :  { %v410_v5 = vld [vmem:[#allocation2 + $0x28] sm:$0xff]  ;;  %v49_v6 = vmax.f32 %v400_v0, %v404_v2  ;;  %v414_v7 = vld [vmem:[#allocation2 + $0x30] sm:$0xff]  ;;  %v50_v8 = vmax.f32 %v402_v1, %v406_v3  ;;  %v418_v9 = vld [vmem:[#allocation2 + $0x38] sm:$0xff]  ;;  %s345_s21 = scalar_lea.vmem %s252_s20, 3328  ;;  %p350_p9 = scmp.lt.s32.totalorder %s252_s20, %s252_s20 }
  0x16   :  { %v420_v10 = vld [vmem:[#allocation2 + $0x40] sm:$0xff]  ;;  %v422_v11 = vld [vmem:[#allocation2 + $0x48] sm:$0xff]  ;;  %v430_v16 = vld [vmem:[#allocation2 + $0x70] sm:$0xff]  ;;  %p346_p8 = scmp.ne.s32.totalorder %s252_s20, %s345_s21  ;;  %p351_p10 = scmp.lt.s32.totalorder %s345_s21, %s345_s21 }
  0x17   :  { %v51_v12 = vmax.f32 %v49_v6, %v408_v4  ;;  %v425_v13 = vld [vmem:[#allocation2 + $0x60] sm:$0xff]  ;;  %v52_v14 = vmax.f32 %v50_v8, %v410_v5  ;;  %v428_v15 = vld [vmem:[#allocation2 + $0x68] sm:$0xff]  ;;  %v433_v18 = vld [vmem:[#allocation2 + $0x78] sm:$0xff] }
  0x18   :  { %v435_v19 = vld [vmem:[#allocation2 + $0x80] sm:$0xff]  ;;  %v437_v20 = vld [vmem:[#allocation2 + $0x88] sm:$0xff]  ;;  %v439_v21 = vld [vmem:[#allocation2 + $0x50] sm:$0xff]  ;;  %v65_v24 = vmax.f32 %v428_v15, %v433_v18  ;;  %v60_v31 = vsel %vm59_vm0, %v425_v13, -inf  ;;  %p352_p11 = por %p351_p10, %p350_p9 }
  0x19   :  { %v53_v17 = vmax.f32 %v51_v12, %v414_v7  ;;  %v54_v22 = vmax.f32 %v52_v14, %v418_v9  ;;  %v442_v23 = vld [vmem:[#allocation2 + $0x90] sm:$0xff]  ;;  %v66_v25 = vmax.f32 %v430_v16, %v435_v19  ;;  %v448_v26 = vld [vmem:[#allocation2 + $0x58] sm:$0xff]  ;;  %v453_v29 = vld [vmem:[#allocation2 + $0xa0] sm:$0xff] }
  0x1a   :  { %v451_v28 = vld [vmem:[#allocation2 + $0x98] sm:$0xff]  ;;  %v67_v32 = vmax.f32 %v65_v24, %v437_v20  ;;  %v461_v35 = vld [vmem:[#allocation2 + $0xa8] sm:$0xff]  ;;  %v463_v36 = vld [vmem:[#allocation2 + $0xb0] sm:$0xff]  ;;  %p353_p12 = pnand %p352_p11, %p346_p8 }
  0x1b   :  { %v55_v27 = vmax.f32 %v53_v17, %v420_v10  ;;  %v56_v30 = vmax.f32 %v54_v22, %v422_v11  ;;  %v68_v33 = vmax.f32 %v66_v25, %v442_v23  ;;  %v466_v38 = vld [vmem:[#allocation2 + $0xc8] sm:$0xff]  ;;  %v470_v42 = vld [vmem:[#allocation2 + $0xb8] sm:$0xff]  ;;  %v472_v43 = vld [vmem:[#allocation2 + $0xc0] sm:$0xff] }
  0x1c   :  { %v69_v39 = vmax.f32 %v67_v32, %v451_v28  ;;  %v75_v47 = vsel %vm59_vm0, %v466_v38, -inf }
  0x1d   :  { %v57_v34 = vmax.f32 %v55_v27, %v439_v21  ;;  %v58_v37 = vmax.f32 %v56_v30, %v448_v26  ;;  %v70_v40 = vmax.f32 %v68_v33, %v453_v29 }
  0x1e   :  { %v71_v44 = vmax.f32 %v69_v39, %v461_v35 }
  0x1f   :  { %v61_v41 = vmax.f32 %v57_v34, %v60_v31  ;;  %v72_v45 = vmax.f32 %v70_v40, %v463_v36 }
  0x20   :  { %v73_v48 = vmax.f32 %v71_v44, %v470_v42 }
  0x21   :  { %v62_v46 = vmax.f32 %v61_v41, %v58_v37  ;;  %v74_v49 = vmax.f32 %v72_v45, %v472_v43 }
  0x22   :  { %v76_v50 = vmax.f32 %v73_v48, %v75_v47 }
  0x23   :  { %63 = vmax.xlane.f32.xlu0 %v62_v46 }
  0x24   :  { %v77_v51 = vmax.f32 %v76_v50, %v74_v49 }
  0x27   :  { %78 = vmax.xlane.f32.xlu0 %v77_v51 }
  0xb0   :  { %v480_v52 = vpop.xlane.xlu0 %63 }
  0xb1   :  { %v80_v53 = vsub.f32 %v400_v0, %v480_v52  ;;  %v81_v54 = vsub.f32 %v402_v1, %v480_v52  ;;  %v82_v55 = vsub.f32 %v404_v2, %v480_v52  ;;  %v83_v56 = vsub.f32 %v406_v3, %v480_v52 }
  0xb2   :  { %v84_v59 = vsub.f32 %v408_v4, %v480_v52  ;;  %v85_v61 = vsub.f32 %v410_v5, %v480_v52  ;;  %v86_v6 = vsub.f32 %v414_v7, %v480_v52  ;;  %v87_v8 = vsub.f32 %v418_v9, %v480_v52 }
  0xb3   :  { %v106_v57 = vmul.f32 1.442695, %v80_v53  ;;  %v108_v58 = vmul.f32 1.442695, %v81_v54  ;;  %v110_v60 = vmul.f32 1.442695, %v82_v55  ;;  %v88_v14 = vsub.f32 %v420_v10, %v480_v52 }
  0xb4   :  { %v112_v62 = vmul.f32 1.442695, %v83_v56  ;;  %v494_v63 = vpop.xlane.xlu0 %78  ;;  %v114_v12 = vmul.f32 1.442695, %v84_v59  ;;  %v116_v17 = vmul.f32 1.442695, %v85_v61  ;;  %v89_v27 = vsub.f32 %v422_v11, %v480_v52 }
  0xb5   :  { %267 = vpow2.f32 %v106_v57  ;;  %v93_v22 = vsub.f32 %v428_v15, %v494_v63  ;;  %v118_v24 = vmul.f32 1.442695, %v86_v6  ;;  %v94_v25 = vsub.f32 %v430_v16, %v494_v63 }
  0xb6   :  { %269 = vpow2.f32 %v108_v58  ;;  %v120_v30 = vmul.f32 1.442695, %v87_v8  ;;  %v122_v31 = vmul.f32 1.442695, %v88_v14  ;;  %v95_v32 = vsub.f32 %v433_v18, %v494_v63 }
  0xb7   :  { %271 = vpow2.f32 %v110_v60  ;;  %v90_v33 = vsub.f32 %v439_v21, %v480_v52  ;;  %v132_v34 = vmul.f32 1.442695, %v93_v22  ;;  %v96_v39 = vsub.f32 %v435_v19, %v494_v63 }
  0xb8   :  { %273 = vpow2.f32 %v112_v62  ;;  %v134_v40 = vmul.f32 1.442695, %v94_v25  ;;  %v92_v44 = vsub.f32 %v425_v13, %v480_v52  ;;  %v124_v45 = vmul.f32 1.442695, %v89_v27 }
  0xb9   :  { %275 = vpow2.f32 %v114_v12  ;;  %v97_v47 = vsub.f32 %v437_v20, %v494_v63  ;;  %v136_v48 = vmul.f32 1.442695, %v95_v32  ;;  %v91_v50 = vsub.f32 %v448_v26, %v480_v52 }
  0xba   :  { %277 = vpow2.f32 %v116_v17  ;;  %v126_v51 = vmul.f32 1.442695, %v90_v33  ;;  %v98_v54 = vsub.f32 %v442_v23, %v494_v63  ;;  %v138_v55 = vmul.f32 1.442695, %v96_v39 }
  0xbb   :  { %279 = vpow2.f32 %v118_v24  ;;  %v130_v57 = vmul.f32 1.442695, %v92_v44  ;;  %v99_v59 = vsub.f32 %v451_v28, %v494_v63  ;;  %v140_v60 = vmul.f32 1.442695, %v97_v47 }
  0xbc   :  { %281 = vpow2.f32 %v120_v30  ;;  %v128_v62 = vmul.f32 1.442695, %v91_v50  ;;  %v100_v8 = vsub.f32 %v453_v29, %v494_v63  ;;  %v142_v12 = vmul.f32 1.442695, %v98_v54 }
  0xbd   :  { %283 = vpow2.f32 %v122_v31  ;;  %v101_v24 = vsub.f32 %v461_v35, %v494_v63  ;;  %v144_v25 = vmul.f32 1.442695, %v99_v59  ;;  %v102_v32 = vsub.f32 %v463_v36, %v494_v63 }
  0xbe   :  { %285 = vpow2.f32 %v132_v34  ;;  %v146_v33 = vmul.f32 1.442695, %v100_v8 }
  0xbf   :  { %v268_v37 = vpop.eup %267  ;;  %287 = vpow2.f32 %v134_v40  ;;  %v103_v40 = vsub.f32 %v470_v42, %v494_v63  ;;  %v150_v50 = vmul.f32 1.442695, %v102_v32 }
  0xc0   :  { %v270_v41 = vpop.eup %269  ;;  %289 = vpow2.f32 %v124_v45  ;;  %v105_v45 = vsub.f32 %v466_v38, %v494_v63 }
  0xc1   :  { %v158_v46 = vadd.f32 %v270_v41, %v268_v37  ;;  %v272_v49 = vpop.eup %271  ;;  %291 = vpow2.f32 %v136_v48  ;;  %v148_v41 = vmul.f32 1.442695, %v101_v24 }
  0xc2   :  { %v274_v56 = vpop.eup %273  ;;  %293 = vpow2.f32 %v126_v51 }
  0xc3   :  { %v159_v53 = vadd.f32 %v272_v49, %v158_v46  ;;  %v276_v61 = vpop.eup %275  ;;  %295 = vpow2.f32 %v138_v55  ;;  %v104_v49 = vsub.f32 %v472_v43, %v494_v63 }
  0xc4   :  { %v278_v14 = vpop.eup %277  ;;  %297 = vpow2.f32 %v130_v57 }
  0xc5   :  { %v160_v58 = vadd.f32 %v274_v56, %v159_v53  ;;  %v280_v17 = vpop.eup %279  ;;  %299 = vpow2.f32 %v140_v60  ;;  %v152_v56 = vmul.f32 1.442695, %v103_v40 }
  0xc6   :  { %v282_v27 = vpop.eup %281  ;;  %301 = vpow2.f32 %v128_v62  ;;  %v154_v62 = vmul.f32 1.442695, %v104_v49 }
  0xc7   :  { %v161_v6 = vadd.f32 %v276_v61, %v160_v58  ;;  %v284_v30 = vpop.eup %283  ;;  %303 = vpow2.f32 %v142_v12  ;;  %v156_v58 = vmul.f32 1.442695, %v105_v45 }
  0xc8   :  { %v286_v34 = vpop.eup %285  ;;  %305 = vpow2.f32 %v144_v25 }
  0xc9   :  { %v162_v22 = vadd.f32 %v278_v14, %v161_v6  ;;  %v288_v37 = vpop.eup %287  ;;  %307 = vpow2.f32 %v146_v33 }
  0xca   :  { %v290_v44 = vpop.eup %289  ;;  %v173_v46 = vadd.f32 %v288_v37, %v286_v34  ;;  %309 = vpow2.f32 %v148_v41 }
  0xcb   :  { %v163_v31 = vadd.f32 %v280_v17, %v162_v22  ;;  %v292_v47 = vpop.eup %291  ;;  %311 = vpow2.f32 %v150_v50 }
  0xcc   :  { %v294_v51 = vpop.eup %293  ;;  %v174_v53 = vadd.f32 %v292_v47, %v173_v46  ;;  %313 = vpow2.f32 %v152_v56 }
  0xcd   :  { %v164_v39 = vadd.f32 %v282_v27, %v163_v31  ;;  %v296_v54 = vpop.eup %295  ;;  %315 = vpow2.f32 %v156_v58 }
  0xce   :  { %v298_v57 = vpop.eup %297  ;;  %v175_v59 = vadd.f32 %v296_v54, %v174_v53  ;;  %317 = vpow2.f32 %v154_v62 }
  0xcf   :  { %v165_v48 = vadd.f32 %v284_v30, %v164_v39  ;;  %v300_v60 = vpop.eup %299  ;;  %v169_v17 = vsel %vm59_vm0, %v298_v57, 0.0 }
  0xd0   :  { %v302_v6 = vpop.eup %301  ;;  %v176_v8 = vadd.f32 %v300_v60, %v175_v59 }
  0xd1   :  { %v166_v55 = vadd.f32 %v290_v44, %v165_v48  ;;  %v304_v12 = vpop.eup %303 }
  0xd2   :  { %v177_v22 = vadd.f32 %v304_v12, %v176_v8  ;;  %v306_v24 = vpop.eup %305 }
  0xd3   :  { %v167_v61 = vadd.f32 %v294_v51, %v166_v55  ;;  %v308_v30 = vpop.eup %307 }
  0xd4   :  { %v178_v27 = vadd.f32 %v306_v24, %v177_v22  ;;  %v310_v32 = vpop.eup %309 }
  0xd5   :  { %v168_v14 = vadd.f32 %v302_v6, %v167_v61  ;;  %v312_v34 = vpop.eup %311 }
  0xd6   :  { %v179_v31 = vadd.f32 %v308_v30, %v178_v27  ;;  %v314_v39 = vpop.eup %313 }
  0xd7   :  { %v170_v25 = vadd.f32 %v169_v17, %v168_v14  ;;  %v316_v40 = vpop.eup %315 }
  0xd8   :  { %v180_v33 = vadd.f32 %v310_v32, %v179_v31  ;;  %v318_v44 = vpop.eup %317  ;;  %v184_v46 = vsel %vm59_vm0, %v316_v40, 0.0 }
  0xd9   :  { %171 = vadd.xlane.f32.xlu1 %v170_v25 }
  0xda   :  { %v181_v37 = vadd.f32 %v312_v34, %v180_v33 }
  0xdc   :  { %v182_v41 = vadd.f32 %v314_v39, %v181_v37 }
  0xde   :  { %v183_v45 = vadd.f32 %v318_v44, %v182_v41 }
  0xe0   :  { %v185_v47 = vadd.f32 %v184_v46, %v183_v45 }
  0xe2   :  { %186 = vadd.xlane.f32.xlu1 %v185_v47 }
 0x166   :  { %v172_v48 = vpop.xlane.xlu1 %171 }
 0x167   :  { %319 = vlog2.f32 %v172_v48 }
 0x16f   :  { %v187_v51 = vpop.xlane.xlu1 %186 }
 0x170   :  { %321 = vlog2.f32 %v187_v51 }
 0x171   :  { %v320_v49 = vpop.eup %319 }
 0x172   :  { %v189_v50 = vmul.f32 0.6931472, %v320_v49 }
 0x174   :  { %v192_v53 = vadd.f32 %v189_v50, %v480_v52 }
 0x176   :  { %v194_v54 = vsub.f32 %v400_v0, %v192_v53  ;;  %v195_v55 = vsub.f32 %v402_v1, %v192_v53  ;;  %v196_v56 = vsub.f32 %v404_v2, %v192_v53  ;;  %v197_v57 = vsub.f32 %v406_v3, %v192_v53 }
 0x177   :  { %v198_v58 = vsub.f32 %v408_v4, %v192_v53  ;;  %v199_v59 = vsub.f32 %v410_v5, %v192_v53  ;;  %v200_v60 = vsub.f32 %v414_v7, %v192_v53  ;;  %v201_v61 = vsub.f32 %v418_v9, %v192_v53 }
 0x178   :  { %v202_v62 = vsub.f32 %v420_v10, %v192_v53  ;;  %v203_v52 = vsub.f32 %v422_v11, %v192_v53  ;;  %v204_v0 = vsub.f32 %v439_v21, %v192_v53  ;;  %v205_v1 = vsub.f32 %v448_v26, %v192_v53  ;;  %220 = vst [vmem:[#allocation5] sm:$0xff] %v194_v54 }
 0x179   :  { %221 = vst [vmem:[#allocation5 + $0x8] sm:$0xff] %v195_v55  ;;  %222 = vst [vmem:[#allocation5 + $0x10] sm:$0xff] %v196_v56  ;;  %v206_v2 = vsub.f32 %v425_v13, %v192_v53 }
 0x17a   :  { %223 = vst [vmem:[#allocation5 + $0x18] sm:$0xff] %v197_v57  ;;  %224 = vst [vmem:[#allocation5 + $0x20] sm:$0xff] %v198_v58  ;;  %v322_v3 = vpop.eup %321 }
 0x17b   :  { %225 = vst [vmem:[#allocation5 + $0x28] sm:$0xff] %v199_v59  ;;  %226 = vst [vmem:[#allocation5 + $0x30] sm:$0xff] %v200_v60  ;;  %v191_v4 = vmul.f32 0.6931472, %v322_v3 }
 0x17c   :  { %227 = vst [vmem:[#allocation5 + $0x38] sm:$0xff] %v201_v61  ;;  %228 = vst [vmem:[#allocation5 + $0x40] sm:$0xff] %v202_v62 }
 0x17d   :  { %229 = vst [vmem:[#allocation5 + $0x48] sm:$0xff] %v203_v52  ;;  %230 = vst [vmem:[#allocation5 + $0x50] sm:$0xff] %v204_v0  ;;  %v193_v5 = vadd.f32 %v191_v4, %v494_v63 }
 0x17e   :  { %231 = vst [vmem:[#allocation5 + $0x58] sm:$0xff] %v205_v1  ;;  %232 = vst.msk [vmem:[#allocation5 + $0x60] sm:$0xff] %vm59_vm0, %v206_v2 }
 0x17f   :  { %v207_v7 = vsub.f32 %v428_v15, %v193_v5  ;;  %v208_v9 = vsub.f32 %v430_v16, %v193_v5  ;;  %v209_v10 = vsub.f32 %v433_v18, %v193_v5  ;;  %v210_v11 = vsub.f32 %v435_v19, %v193_v5 }
 0x180   :  { %v211_v13 = vsub.f32 %v437_v20, %v193_v5  ;;  %v212_v21 = vsub.f32 %v442_v23, %v193_v5  ;;  %v213_v26 = vsub.f32 %v451_v28, %v193_v5  ;;  %v214_v6 = vsub.f32 %v453_v29, %v193_v5 }
 0x181   :  { %v215_v63 = vsub.f32 %v461_v35, %v193_v5  ;;  %v216_v15 = vsub.f32 %v463_v36, %v193_v5  ;;  %v217_v16 = vsub.f32 %v470_v42, %v193_v5  ;;  %v218_v18 = vsub.f32 %v472_v43, %v193_v5  ;;  %233 = vst [vmem:[#allocation5 + $0x68] sm:$0xff] %v207_v7 }
 0x182   :  { %234 = vst [vmem:[#allocation5 + $0x70] sm:$0xff] %v208_v9  ;;  %235 = vst [vmem:[#allocation5 + $0x78] sm:$0xff] %v209_v10  ;;  %v219_v19 = vsub.f32 %v466_v38, %v193_v5 }
 0x183   :  { %236 = vst [vmem:[#allocation5 + $0x80] sm:$0xff] %v210_v11  ;;  %237 = vst [vmem:[#allocation5 + $0x88] sm:$0xff] %v211_v13 }
 0x184   :  { %238 = vst [vmem:[#allocation5 + $0x90] sm:$0xff] %v212_v21  ;;  %239 = vst [vmem:[#allocation5 + $0x98] sm:$0xff] %v213_v26 }
 0x185   :  { %240 = vst [vmem:[#allocation5 + $0xa0] sm:$0xff] %v214_v6  ;;  %241 = vst [vmem:[#allocation5 + $0xa8] sm:$0xff] %v215_v63 }
 0x186   :  { %242 = vst [vmem:[#allocation5 + $0xb0] sm:$0xff] %v216_v15  ;;  %243 = vst [vmem:[#allocation5 + $0xb8] sm:$0xff] %v217_v16 }
 0x187   :  { %244 = vst [vmem:[#allocation5 + $0xc0] sm:$0xff] %v218_v18  ;;  %245 = vst.msk [vmem:[#allocation5 + $0xc8] sm:$0xff] %vm59_vm0, %v219_v19 }
 0x188   :  { %356 = shalt.err (!%p353_p12)
}
 0x189   :  { %s357_s24 = scalar_lea.hbm %s584_s1, 3328 }
 0x18a   :  { %p358_p13 = scmp.ne.s32.totalorder %s584_s1, %s357_s24  ;;  %p361_p0 = scmp.lt.u32.totalorder %s357_s24, %s584_s1 }
 0x18c   :  { %p363_p1 = pnand %p361_p0, %p358_p13 }
 0x18e   :  { %366 = shalt.err (!%p363_p1)
}
 0x18f   :  { %257 = dma.vmem_to_hbm [thread:$0]  %s252_s20, 3328, %s584_s1, [#allocation4], %s372_s16, %s372_s16, %s373_s17  }
 0x190   :  { %369 = dma.done.wait [#allocation4], 3328  }
 0x191   :  { %370 = vsyncadd [#allocation4], 4294963968 }
 0x192   :  { %261 = vsyncpa [#allocation3], 1 }
 0x193   :  { %262 = vsyncpa [#allocation4], 1 }

</bundles_post_ra>
